<compile_context>
chip_gen: v7x
topology: tpu7x:2x2x1
jax: 0.10.0
libtpu: 0.0.40
codegen_flags: <defaults>
</compile_context>

<pallas_src>
import jax
import jax.numpy as jnp
from jax.experimental import pallas as pl
from jax.experimental.pallas import tpu as pltpu


# --------------------------------------------------------------------------- #
# Pass 1: z = x @ W_lin  +  BatchNorm batch statistics (sum, sum of squares)
# --------------------------------------------------------------------------- #
def _linear_stats_kernel(x_ref, wlin_ref, z_ref, sum_ref, sumsq_ref):
    # bf16 operands, f32 accumulation on the MXU.
    z = jax.lax.dot_general(
        x_ref[...], wlin_ref[...],
        dimension_numbers=(((2,), (0,)), ((), ())),
        preferred_element_type=jnp.float32)                 # (Tc, N_pad, H) f32

    # Stream z back as bf16 (it is an MXU operand downstream anyway).
    z_ref[...] = z.astype(jnp.bfloat16)

    @pl.when(pl.program_id(0) == 0)
    def _():
        sum_ref[...] = jnp.zeros_like(sum_ref)
        sumsq_ref[...] = jnp.zeros_like(sumsq_ref)

    # Zero-padded (T, N) rows contribute exactly zero to both sums; the real row
    # count is applied as the denominator on the host.
    sum_ref[...] += jnp.sum(z, axis=(0, 1), keepdims=True)        # (1, 1, H)
    sumsq_ref[...] += jnp.sum(z * z, axis=(0, 1), keepdims=True)  # (1, 1, H)


# --------------------------------------------------------------------------- #
# Pass 2: LSTM recurrence over T-chunks, (h, c) carried in VMEM scratch
# --------------------------------------------------------------------------- #
def _lstm_kernel(z_ref, wih_ref, bias_ref, whh_ref, out_ref, h_scr, c_scr, gx_scr):
    Tc, n_blk, H = out_ref.shape

    # Re-init state at the first T-chunk of every batch block
    # (grid = (batch_blocks, t_chunks); the T axis is grid axis 1).
    @pl.when(pl.program_id(1) == 0)
    def _():
        h_scr[...] = jnp.zeros_like(h_scr)
        c_scr[...] = jnp.zeros_like(c_scr)

    # Input-hidden projection for the whole chunk: one MXU matmul.
    # BatchNorm is already folded into wih/bias, so there is no zn pass at all.
    gx = jax.lax.dot_general(
        z_ref[...], wih_ref[...],
        dimension_numbers=(((2,), (0,)), ((), ())),
        preferred_element_type=jnp.float32)                 # (Tc, n_blk, 4H) f32
    gx_scr[...] = (gx + bias_ref[...]).astype(jnp.bfloat16)  # bf16 halves the buffer

    w_hh = whh_ref[...]                                     # bf16, hoisted out of loop

    def step(t, carry):
        h, c = carry                                        # f32 (n_blk, H)
        gates = gx_scr[t].astype(jnp.float32) + jnp.dot(
            h.astype(jnp.bfloat16), w_hh, preferred_element_type=jnp.float32)
        # Fused gate order is (i, f, o, g): the three sigmoid gates are one
        # contiguous slice -> approx reciprocal on the EUP; g is a direct tanh.
        sig = pl.reciprocal(1.0 + jnp.exp(-gates[:, :3 * H]), approx=True)
        g = jnp.tanh(gates[:, 3 * H:])
        i = sig[:, 0:H]
        f = sig[:, H:2 * H]
        o = sig[:, 2 * H:3 * H]
        c_new = f * c + i * g
        h_new = o * jnp.tanh(c_new)
        out_ref[t] = h_new.astype(out_ref.dtype)
        return (h_new, c_new)

    # Unroll x2 unless the per-step gate block would blow the vreg file.
    unroll = 2 if (n_blk * 4 * H) <= 16384 else 1
    h_last, c_last = jax.lax.fori_loop(0, Tc, step, (h_scr[...], c_scr[...]),
                                       unroll=unroll)
    h_scr[...] = h_last
    c_scr[...] = c_last


# --------------------------------------------------------------------------- #
# Wrapper
# --------------------------------------------------------------------------- #
def _vmem_limit_bytes():
    try:
        cap = int(pltpu.get_tpu_info().vmem_capacity_bytes)
    except Exception:
        cap = 64 * 1024 * 1024
    # Leave headroom below physical VMEM (v5e/v6e 128 MiB -> ~96; v7x 64 MiB -> ~48).
    return (cap * 3) // 4


def batch_lstm(x, w_lin, gamma, beta, w_ih, w_hh):
    """x: (T, N, D); w_lin: (D, H); gamma/beta broadcastable to (H,);
    w_ih/w_hh: (4, H, H) with PyTorch gate order i, f, g, o (gate = in @ w[g])."""
    T, N, D = x.shape
    H = w_lin.shape[1]
    eps = 1e-5

    vmem_limit = int(_vmem_limit_bytes())

    def cparams(sem):
        return pltpu.CompilerParams(dimension_semantics=sem,
                                    vmem_limit_bytes=vmem_limit)

    # Pad batch to a multiple of 16 sublanes (bf16 LHS packing). Zero rows do not
    # perturb the BN sums and their LSTM outputs are sliced off at the end.
    N_pad = ((N + 15) // 16) * 16
    n_blocks = 2 if N_pad >= 32 else 1         # batch split across v7x's 2 TCs
    n_block = N_pad // n_blocks

    # T-chunk size from the VMEM budget (streamed z/out double buffers + bf16 gx
    # scratch + f32 temporaries), leaving room for the resident fused weights.
    weight_bytes = 2 * (H * 4 * H) * 2                       # w_ih' + w_hh in bf16
    stream_budget = max(vmem_limit - weight_bytes, vmem_limit // 4)
    per_t = 40 * n_block * H                                 # conservative bytes / step
    t_chunk = int(max(8, min(T, stream_budget // (2 * per_t))))
    num_chunks = (T + t_chunk - 1) // t_chunk
    T_pad = num_chunks * t_chunk

    # Cast x to bf16 in the wrapper (halves the HBM->VMEM stream), then zero-pad.
    x = x.astype(jnp.bfloat16)
    if N_pad != N or T_pad != T:
        x = jnp.pad(x, ((0, T_pad - T), (0, N_pad - N), (0, 0)))

    # ---- pass 1: z = x @ W_lin and BN batch statistics ----
    z, zsum, zsumsq = pl.pallas_call(
        _linear_stats_kernel,
        out_shape=(jax.ShapeDtypeStruct((T_pad, N_pad, H), jnp.bfloat16),
                   jax.ShapeDtypeStruct((1, 1, H), jnp.float32),
                   jax.ShapeDtypeStruct((1, 1, H), jnp.float32)),
        grid=(num_chunks,),
        in_specs=[pl.BlockSpec((t_chunk, N_pad, D), lambda i: (i, 0, 0)),
                  pl.BlockSpec((D, H), lambda i: (0, 0))],
        out_specs=(pl.BlockSpec((t_chunk, N_pad, H), lambda i: (i, 0, 0)),
                   pl.BlockSpec((1, 1, H), lambda i: (0, 0, 0)),
                   pl.BlockSpec((1, 1, H), lambda i: (0, 0, 0))),
        compiler_params=cparams(("arbitrary",)),
    )(x, w_lin.astype(jnp.bfloat16))

    # ---- fold BatchNorm (training-mode batch stats, biased var) into W_ih ----
    denom = 1.0 / float(T * N)                 # real row count; padded rows are zero
    mean = jnp.reshape(zsum, (H,)) * denom
    ex2 = jnp.reshape(zsumsq, (H,)) * denom
    var = jnp.maximum(ex2 - mean * mean, 0.0)  # clamp: E[z^2]-E[z]^2 cancellation
    gamma = jnp.reshape(gamma, (H,)).astype(jnp.float32)
    beta = jnp.reshape(beta, (H,)).astype(jnp.float32)
    s = gamma * jax.lax.rsqrt(var + eps)

    # Fused gate weights reordered to (i, f, o, g) so sigmoid gates are contiguous.
    order = (0, 1, 3, 2)
    w_ih_f = jnp.concatenate([w_ih[k] for k in order], axis=1).astype(jnp.float32)
    w_hh_f = jnp.concatenate([w_hh[k] for k in order], axis=1).astype(jnp.float32)
    w_ih_s = (s[:, None] * w_ih_f).astype(jnp.bfloat16)       # (H, 4H)  BN-scaled
    bias = ((beta - mean * s) @ w_ih_f)[None, :]              # (1, 4H)  f32
    w_hh_b = w_hh_f.astype(jnp.bfloat16)

    # ---- pass 2: LSTM recurrence, streamed over T-chunks, batch-split over cores ----
    out = pl.pallas_call(
        _lstm_kernel,
        out_shape=jax.ShapeDtypeStruct((T_pad, N_pad, H), jnp.float32),
        grid=(n_blocks, num_chunks),
        in_specs=[pl.BlockSpec((t_chunk, n_block, H), lambda b, t: (t, b, 0)),
                  pl.BlockSpec((H, 4 * H), lambda b, t: (0, 0)),
                  pl.BlockSpec((1, 4 * H), lambda b, t: (0, 0)),
                  pl.BlockSpec((H, 4 * H), lambda b, t: (0, 0))],
        out_specs=pl.BlockSpec((t_chunk, n_block, H), lambda b, t: (t, b, 0)),
        scratch_shapes=[
            pltpu.VMEM((n_block, H), jnp.float32),                  # h state
            pltpu.VMEM((n_block, H), jnp.float32),                  # c state
            pltpu.VMEM((t_chunk, n_block, 4 * H), jnp.bfloat16),    # gx chunk
        ],
        compiler_params=cparams(("parallel", "arbitrary")),
    )(z, w_ih_s, bias, w_hh_b)

    # TODO(synk): if deployment H < 128 the output slab is lane-sparse; stage h into
    # a lane-dense layout before the final writeback for full store bandwidth.
    return out[:T, :N, :]


# --------------------------------------------------------------------------- #
# Pure-JAX f32 reference replicating the PyTorch forward math
# --------------------------------------------------------------------------- #
def batch_lstm_reference(x, w_lin, gamma, beta, w_ih, w_hh):
    T, N, D = x.shape
    z = jnp.einsum('tnd,dh->tnh', x, w_lin)
    mean = jnp.mean(z, axis=(0, 1), keepdims=True)
    var = jnp.mean((z - mean) ** 2, axis=(0, 1), keepdims=True)
    zn = (z - mean) / jnp.sqrt(var + 1e-5) * gamma + beta
    H = w_lin.shape[1]
    h = jnp.zeros((N, H), jnp.float32)
    c = jnp.zeros((N, H), jnp.float32)
    outs = []
    for t in range(T):
        xt = zn[t]
        gi = xt @ w_ih[0] + h @ w_hh[0]
        gf = xt @ w_ih[1] + h @ w_hh[1]
        gg = xt @ w_ih[2] + h @ w_hh[2]
        go = xt @ w_ih[3] + h @ w_hh[3]
        i = jax.nn.sigmoid(gi)
        f = jax.nn.sigmoid(gf)
        g = jnp.tanh(gg)
        o = jax.nn.sigmoid(go)
        c = f * c + i * g
        h = o * jnp.tanh(c)
        outs.append(h)
    return jnp.stack(outs, axis=0)


if __name__ == "__main__":
    T, N, D_in, H = 8, 2, 16, 32

    key = jax.random.PRNGKey(0)
    k_x, k_lin, k_g, k_b, k_ih, k_hh = jax.random.split(key, 6)

    bound = 1.0 / jnp.sqrt(jnp.float32(H))
    x = jax.random.normal(k_x, (T, N, D_in), dtype=jnp.float32)
    # Linear weight stored as (D, H)  (== PyTorch weight (H, D) transposed)
    w_lin = jax.random.uniform(k_lin, (D_in, H), jnp.float32, -bound, bound)
    # BatchNorm affine params (deterministic, non-trivial)
    gamma = 1.0 + 0.1 * jax.random.normal(k_g, (1, 1, H), dtype=jnp.float32)
    beta = 0.1 * jax.random.normal(k_b, (1, 1, H), dtype=jnp.float32)
    # LSTM weights, gate order i,f,g,o, stored as (4, H, H) so gate = in @ w[g]
    # (== PyTorch weight_ih_l0 / weight_hh_l0 of shape (4H, H), split & transposed)
    w_ih = jax.random.uniform(k_ih, (4, H, H), jnp.float32, -bound, bound)
    w_hh = jax.random.uniform(k_hh, (4, H, H), jnp.float32, -bound, bound)

    out = batch_lstm(x, w_lin, gamma, beta, w_ih, w_hh)
    out = jax.block_until_ready(out)

    ref = batch_lstm_reference(x, w_lin, gamma, beta, w_ih, w_hh)
    assert out.shape == (T, N, H)
    # Tolerance sized for bf16 matmul operands / bf16 z,gx storage with f32 accumulation.
    err = jnp.max(jnp.abs(out - ref))
    assert jnp.allclose(out, ref, atol=2e-2, rtol=2e-2), f"max abs err {err}"

    print("KERNEL_OK")
</pallas_src>

<mosaic_0001>
module attributes {stable_mosaic.version = 11 : i64} {
  func.func @_linear_stats_kernel(%arg0: i32, %arg1: memref<8x16x16xbf16, #tpu.memory_space<vmem>>, %arg2: memref<16x32xbf16, #tpu.memory_space<vmem>>, %arg3: memref<8x16x32xbf16, #tpu.memory_space<vmem>>, %arg4: memref<1x1x32xf32, #tpu.memory_space<vmem>>, %arg5: memref<1x1x32xf32, #tpu.memory_space<vmem>>) attributes {dimension_semantics = [#tpu.dimension_semantics<arbitrary>], iteration_bounds = array<i64: 1>, scalar_prefetch = 0 : i64, scratch_operands = 0 : i64, tpu.core_type = #tpu.core_type<tc>, window_params = [{transform_indices = @transform_0, window_bounds = array<i64: 8, 16, 16>}, {pipeline_mode = #tpu.pipeline_mode<synchronous>, transform_indices = @transform_1, window_bounds = array<i64: 16, 32>}, {transform_indices = @transform_2, window_bounds = array<i64: 8, 16, 32>}, {pipeline_mode = #tpu.pipeline_mode<synchronous>, transform_indices = @transform_3, window_bounds = array<i64: 1, 1, 32>}, {pipeline_mode = #tpu.pipeline_mode<synchronous>, transform_indices = @transform_4, window_bounds = array<i64: 1, 1, 32>}]} {
    %c0 = arith.constant 0 : index
    %c0_0 = arith.constant 0 : index
    %c0_1 = arith.constant 0 : index
    %0 = vector.load %arg1[%c0, %c0_0, %c0_1] : memref<8x16x16xbf16, #tpu.memory_space<vmem>>, vector<8x16x16xbf16>
    %c0_2 = arith.constant 0 : index
    %c0_3 = arith.constant 0 : index
    %1 = vector.load %arg2[%c0_2, %c0_3] : memref<16x32xbf16, #tpu.memory_space<vmem>>, vector<16x32xbf16>
    %cst = arith.constant dense<0.000000e+00> : vector<8x16x32xf32>
    %2 = tpu.matmul %0, %1, %cst {dimension_numbers = #tpu.dot_dimension_numbers<[2], [0], [0, 1], [1], [0, 0, 0, 1, 1, 1], [], []>} : vector<8x16x16xbf16>, vector<16x32xbf16>, vector<8x16x32xf32> -> vector<8x16x32xf32>
    %3 = arith.truncf %2 : vector<8x16x32xf32> to vector<8x16x32xbf16>
    %c0_4 = arith.constant 0 : index
    %c0_5 = arith.constant 0 : index
    %c0_6 = arith.constant 0 : index
    %4 = vector.load %arg3[%c0_4, %c0_5, %c0_6] : memref<8x16x32xbf16, #tpu.memory_space<vmem>>, vector<8x16x32xbf16>
    tpu.vector_store %arg3[%c0_4, %c0_5, %c0_6], %3 {strides = array<i32>} : memref<8x16x32xbf16, #tpu.memory_space<vmem>>, vector<8x16x32xbf16>,
    %c0_i32 = arith.constant 0 : i32
    %5 = arith.cmpi eq, %arg0, %c0_i32 : i32
    %6 = arith.extui %5 : i1 to i32
    %c0_i32_7 = arith.constant 0 : i32
    %7 = arith.cmpi ne, %6, %c0_i32_7 : i32
    scf.if %7 {
      %cst_22 = arith.constant 0.000000e+00 : f32
      %19 = vector.broadcast %cst_22 : f32 to vector<1x1x32xf32>
      %c0_23 = arith.constant 0 : index
      %c0_24 = arith.constant 0 : index
      %c0_25 = arith.constant 0 : index
      %20 = vector.load %arg4[%c0_23, %c0_24, %c0_25] : memref<1x1x32xf32, #tpu.memory_space<vmem>>, vector<1x1x32xf32>
      tpu.vector_store %arg4[%c0_23, %c0_24, %c0_25], %19 {strides = array<i32>} : memref<1x1x32xf32, #tpu.memory_space<vmem>>, vector<1x1x32xf32>,
      %cst_26 = arith.constant 0.000000e+00 : f32
      %21 = vector.broadcast %cst_26 : f32 to vector<1x1x32xf32>
      %c0_27 = arith.constant 0 : index
      %c0_28 = arith.constant 0 : index
      %c0_29 = arith.constant 0 : index
      %22 = vector.load %arg5[%c0_27, %c0_28, %c0_29] : memref<1x1x32xf32, #tpu.memory_space<vmem>>, vector<1x1x32xf32>
      tpu.vector_store %arg5[%c0_27, %c0_28, %c0_29], %21 {strides = array<i32>} : memref<1x1x32xf32, #tpu.memory_space<vmem>>, vector<1x1x32xf32>,
    } else {
    }
    %c0_8 = arith.constant 0 : index
    %c0_9 = arith.constant 0 : index
    %c0_10 = arith.constant 0 : index
    %8 = vector.load %arg4[%c0_8, %c0_9, %c0_10] : memref<1x1x32xf32, #tpu.memory_space<vmem>>, vector<1x1x32xf32>
    %cst_11 = arith.constant dense<0.000000e+00> : vector<32xf32>
    %9 = vector.multi_reduction <add>, %2, %cst_11 [0, 1] : vector<8x16x32xf32> to vector<32xf32>
    %10 = vector.shape_cast %9 : vector<32xf32> to vector<1x1x32xf32>
    %11 = arith.addf %8, %10 : vector<1x1x32xf32>
    %c0_12 = arith.constant 0 : index
    %c0_13 = arith.constant 0 : index
    %c0_14 = arith.constant 0 : index
    %12 = vector.load %arg4[%c0_12, %c0_13, %c0_14] : memref<1x1x32xf32, #tpu.memory_space<vmem>>, vector<1x1x32xf32>
    tpu.vector_store %arg4[%c0_12, %c0_13, %c0_14], %11 {strides = array<i32>} : memref<1x1x32xf32, #tpu.memory_space<vmem>>, vector<1x1x32xf32>,
    %c0_15 = arith.constant 0 : index
    %c0_16 = arith.constant 0 : index
    %c0_17 = arith.constant 0 : index
    %13 = vector.load %arg5[%c0_15, %c0_16, %c0_17] : memref<1x1x32xf32, #tpu.memory_space<vmem>>, vector<1x1x32xf32>
    %14 = arith.mulf %2, %2 : vector<8x16x32xf32>
    %cst_18 = arith.constant dense<0.000000e+00> : vector<32xf32>
    %15 = vector.multi_reduction <add>, %14, %cst_18 [0, 1] : vector<8x16x32xf32> to vector<32xf32>
    %16 = vector.shape_cast %15 : vector<32xf32> to vector<1x1x32xf32>
    %17 = arith.addf %13, %16 : vector<1x1x32xf32>
    %c0_19 = arith.constant 0 : index
    %c0_20 = arith.constant 0 : index
    %c0_21 = arith.constant 0 : index
    %18 = vector.load %arg5[%c0_19, %c0_20, %c0_21] : memref<1x1x32xf32, #tpu.memory_space<vmem>>, vector<1x1x32xf32>
    tpu.vector_store %arg5[%c0_19, %c0_20, %c0_21], %17 {strides = array<i32>} : memref<1x1x32xf32, #tpu.memory_space<vmem>>, vector<1x1x32xf32>,
    return
  }
  func.func @transform_0(%arg0: i32) -> (i32, i32, i32) {
    %c0_i32 = arith.constant 0 : i32
    %c0_i32_0 = arith.constant 0 : i32
    %c0_i32_1 = arith.constant 0 : i32
    return %arg0, %c0_i32, %c0_i32_0 : i32, i32, i32
  }
  func.func @transform_1(%arg0: i32) -> (i32, i32) {
    %c0_i32 = arith.constant 0 : i32
    %c0_i32_0 = arith.constant 0 : i32
    %c0_i32_1 = arith.constant 0 : i32
    return %c0_i32, %c0_i32_0 : i32, i32
  }
  func.func @transform_2(%arg0: i32) -> (i32, i32, i32) {
    %c0_i32 = arith.constant 0 : i32
    %c0_i32_0 = arith.constant 0 : i32
    %c0_i32_1 = arith.constant 0 : i32
    return %arg0, %c0_i32, %c0_i32_0 : i32, i32, i32
  }
  func.func @transform_3(%arg0: i32) -> (i32, i32, i32) {
    %c0_i32 = arith.constant 0 : i32
    %c0_i32_0 = arith.constant 0 : i32
    %c0_i32_1 = arith.constant 0 : i32
    %c0_i32_2 = arith.constant 0 : i32
    return %c0_i32, %c0_i32_0, %c0_i32_1 : i32, i32, i32
  }
  func.func @transform_4(%arg0: i32) -> (i32, i32, i32) {
    %c0_i32 = arith.constant 0 : i32
    %c0_i32_0 = arith.constant 0 : i32
    %c0_i32_1 = arith.constant 0 : i32
    %c0_i32_2 = arith.constant 0 : i32
    return %c0_i32, %c0_i32_0, %c0_i32_1 : i32, i32, i32
  }
}

</mosaic_0001>

<bundles_post_ra>
// kernel: tpu_custom_call.1
= control target key start
LH: loop header
LB: loop body
LE: loop exit
PB: predicated region body
PF: predicated region fallthrough
CT: control target
= control target key end

     0   :  { %10 = vsyncpa [#allocation3], 0  ;;  %s901_s0 = inlined_call_operand.hbm [shape: bf16[8,16,16], index: 0, kind: input, shape index: {}]   ;;  %s902_s1 = inlined_call_operand.hbm [shape: bf16[16,32], index: 1, kind: input, shape index: {}]   ;;  %s903_s2 = inlined_call_operand.hbm [shape: bf16[8,16,32], index: 2, kind: output, shape index: {0}]   ;;  %s904_s3 = inlined_call_operand.hbm [shape: f32[1,1,32], index: 3, kind: output, shape index: {1}]   ;;  %s905_s4 = inlined_call_operand.hbm [shape: f32[1,1,32], index: 4, kind: output, shape index: {2}]  }
   0x1   :  { %11 = vsyncpa [#allocation6], 0 }
   0x2   :  { %12 = vsyncpa [#allocation4], 0 }
   0x3   :  { %13 = vsyncpa [#allocation9], 0  ;;  %s675_s15 = smov [#allocation2]   ;;  %s557_s19 = scalar_lea.hbm %s901_s0, 1024 }
   0x4   :  { %s19_s16 = sshll.u32 %s675_s15, 4  ;;  %p558_p0 = scmp.ne.s32.totalorder %s901_s0, %s557_s19  ;;  %s20_s16 = int_to_ptr.vmem [resolvable:$true] %s19_s16 }
   0x5   :  { %p561_p1 = scmp.lt.u32.totalorder %s557_s19, %s901_s0 }
   0x7   :  { %p563_p2 = pnand %p561_p1, %p558_p0 }
   0x9   :  { %566 = shalt.err (!%p563_p2)
}
   0xa   :  { %s567_s24 = scalar_lea.vmem %s20_s16, 1024  ;;  %p572_p4 = scmp.lt.s32.totalorder %s20_s16, %s20_s16 }
   0xb   :  { %p568_p3 = scmp.ne.s32.totalorder %s20_s16, %s567_s24  ;;  %p573_p5 = scmp.lt.s32.totalorder %s567_s24, %s567_s24 }
   0xd   :  { %p574_p6 = por %p573_p5, %p572_p4 }
   0xf   :  { %p575_p7 = pnand %p574_p6, %p568_p3 }
  0x11   :  { %578 = shalt.err (!%p575_p7)
}
  0x12   :  { %s676_s25 = smov 64   ;;  %s677_s26 = smov 4  }
  0x13   :  { %25 = dma.hbm_to_vmem [thread:$0]  %s901_s0, 1024, %s20_s16, [#allocation3], %s676_s25, %s676_s25, %s677_s26  }
  0x14   :  { %s678_s29 = smov [#allocation5]   ;;  %s579_s7 = scalar_lea.hbm %s902_s1, 128 }
  0x15   :  { %s31_s30 = sshll.u32 %s678_s29, 4  ;;  %p580_p8 = scmp.ne.s32.totalorder %s902_s1, %s579_s7  ;;  %s32_s30 = int_to_ptr.vmem [resolvable:$true] %s31_s30 }
  0x16   :  { %p583_p9 = scmp.lt.u32.totalorder %s579_s7, %s902_s1 }
  0x18   :  { %p585_p10 = pnand %p583_p9, %p580_p8 }
  0x1a   :  { %588 = shalt.err (!%p585_p10)
}
  0x1b   :  { %s589_s12 = scalar_lea.vmem %s32_s30, 128  ;;  %p594_p12 = scmp.lt.s32.totalorder %s32_s30, %s32_s30 }
  0x1c   :  { %p590_p11 = scmp.ne.s32.totalorder %s32_s30, %s589_s12  ;;  %p595_p13 = scmp.lt.s32.totalorder %s589_s12, %s589_s12 }
  0x1e   :  { %p596_p0 = por %p595_p13, %p594_p12 }
  0x20   :  { %p597_p1 = pnand %p596_p0, %p590_p11 }
  0x22   :  { %600 = shalt.err (!%p597_p1)
}
  0x23   :  { %37 = dma.hbm_to_vmem [thread:$0]  %s902_s1, 128, %s32_s30, [#allocation6], %s676_s25, %s676_s25, %s677_s26  }
  0x24   :  { %667 = dma.done.wait [#allocation3], 1024  }
  0x25   :  { %668 = vsyncadd [#allocation3], 4294966272 }
  0x26   :  { %669 = dma.done.wait [#allocation6], 128  }
  0x27   :  { %670 = vsyncadd [#allocation6], 4294967168  ;;  %v548_v0 = vld [vmem:[#allocation5] sm:$0xff]   ;;  %vm109_vm0 = vcmask 130048   ;;  %v550_v2 = vld [vmem:[#allocation2 + $0x8] sm:$0xff]   ;;  %vm316_vm1 = vcmask 253952  }
  0x28   :  { %v549_v1 = vld [vmem:[#allocation2] sm:$0xff]   ;;  %520 = vmatprep.subr.bf16.mxu0 %v548_v0  ;;  %538 = vmatprep.subr.bf16.mxu1 %v548_v0  ;;  %v551_v3 = vld [vmem:[#allocation2 + $0x10] sm:$0xff]   ;;  %v554_v5 = vld [vmem:[#allocation2 + $0x28] sm:$0xff]   ;;  %v679_v9 = vmov 0.0   ;;  %vm295_vm2 = vcmask 257024   ;;  %vm320_vm3 = vcmask 261120  }
  0x29   :  { %521 = vmatpush3.bf16.msra.mxu0 %v548_v0  ;;  %522 = vmatprep.mubr.msk.bf16.mxu0 %vm109_vm0, %v549_v1  ;;  %v553_v4 = vld [vmem:[#allocation2 + $0x20] sm:$0xff]   ;;  %v555_v6 = vld [vmem:[#allocation2 + $0x30] sm:$0xff]   ;;  %v552_v7 = vld [vmem:[#allocation2 + $0x18] sm:$0xff]   ;;  %317 = vst.msk [vmem:[#allocation8] sm:$0x1] %vm316_vm1, %v679_v9  ;;  %s680_s1 = smov [#allocation7]  }
  0x2a   :  { %539 = vmatpush3.bf16.msra.mxu1 %v548_v0  ;;  %530 = vmatprep.mubr.msk.bf16.mxu1 %vm109_vm0, %v553_v4  ;;  %v556_v8 = vld [vmem:[#allocation2 + $0x38] sm:$0xff]   ;;  %318 = vst.msk [vmem:[#allocation10] sm:$0x1] %vm316_vm1, %v679_v9  ;;  %s422_s14 = sshll.u32 %s680_s1, 4  ;;  %s423_s14 = int_to_ptr.vmem [resolvable:$true] %s422_s14 }
  0x2b   :  { %s601_s15 = scalar_lea.vmem %s423_s14, 1024  ;;  %p606_p3 = scmp.lt.s32.totalorder %s423_s14, %s423_s14 }
  0x2c   :  { %523 = vmatmul.mubr.msk.bf16.vlgmr.msra.gmra.mrb[0].mxu0 %vm109_vm0, %v550_v2  ;;  %p602_p2 = scmp.ne.s32.totalorder %s423_s14, %s601_s15  ;;  %p607_p4 = scmp.lt.s32.totalorder %s601_s15, %s601_s15 }
  0x2d   :  { %526 = vmatprep.mubr.msk.bf16.mxu0 %vm109_vm0, %v551_v3  ;;  %531 = vmatmul.mubr.msk.bf16.vlgmr.msra.gmra.mrb[0].mxu1 %vm109_vm0, %v554_v5 }
  0x2e   :  { %534 = vmatprep.mubr.msk.bf16.mxu1 %vm109_vm0, %v555_v6  ;;  %p608_p5 = por %p607_p4, %p606_p3 }
  0x30   :  { %p609_p6 = pnand %p608_p5, %p602_p2 }
  0x34   :  { %527 = vmatmul.mubr.msk.bf16.gmra.mrb[4].mxu0 %vm109_vm0, %v552_v7 }
  0x35   :  { %535 = vmatmul.mubr.msk.bf16.gmra.mrb[4].mxu1 %vm109_vm0, %v556_v8 }
  0xff   :  { %v524_v10 = vpop.f32.mrb[0].mxu0 }
 0x100   :  { %v497_v11 = vpack.c.bf16 %v524_v10, %v524_v10  ;;  %v168_v12 = vpop.f32.mrb[1].mxu0  ;;  %v748_v16 = vpop.f32.mrb[0].mxu1  ;;  %v364_v17 = vmul.f32 %v524_v10, %v524_v10  ;;  %v324_v30 = vsel %vm320_vm3, %v524_v10, 0.0 }
 0x101   :  { %v495_v13 = vpack.c.bf16 %v168_v12, %v168_v12  ;;  %v362_v14 = vmul.f32 %v168_v12, %v168_v12  ;;  %v525_v15 = vpop.f32.mrb[2].mxu0  ;;  %v751_v20 = vpop.f32.mrb[1].mxu1  ;;  %v321_v21 = vsel %vm320_vm3, %v168_v12, 0.0  ;;  %v505_v28 = vpack.c.bf16 %v748_v16, %v748_v16 }
 0x102   :  { %298 = vst.msk [vmem:[#allocation7 + $0x8] sm:$0xf] %vm295_vm2, %v497_v11  ;;  %v498_v18 = vpack.c.bf16 %v525_v15, %v525_v15  ;;  %v171_v19 = vpop.f32.mrb[3].mxu0  ;;  %v756_v25 = vpop.f32.mrb[2].mxu1  ;;  %v365_v26 = vmul.f32 %v525_v15, %v525_v15  ;;  %v503_v33 = vpack.c.bf16 %v751_v20, %v751_v20  ;;  %v381_v37 = vsel %vm320_vm3, %v364_v17, 0.0 }
 0x103   :  { %296 = vst.msk [vmem:[#allocation7] sm:$0xf] %vm295_vm2, %v495_v13  ;;  %v496_v22 = vpack.c.bf16 %v171_v19, %v171_v19  ;;  %v322_v23 = vsel %vm320_vm3, %v171_v19, 0.0  ;;  %v363_v24 = vmul.f32 %v171_v19, %v171_v19  ;;  %v761_v29 = vpop.f32.mrb[3].mxu1  ;;  %v378_v31 = vsel %vm320_vm3, %v362_v14, 0.0 }
 0x104   :  { %299 = vst.msk [vmem:[#allocation7 + $0xc] sm:$0xf] %vm295_vm2, %v498_v18  ;;  %v323_v27 = vadd.f32 %v322_v23, %v321_v21  ;;  %306 = vst.msk [vmem:[#allocation7 + $0x28] sm:$0xf] %vm295_vm2, %v505_v28  ;;  %v506_v36 = vpack.c.bf16 %v756_v25, %v756_v25  ;;  %v504_v39 = vpack.c.bf16 %v761_v29, %v761_v29  ;;  %v326_v40 = vsel %vm320_vm3, %v525_v15, 0.0 }
 0x105   :  { %297 = vst.msk [vmem:[#allocation7 + $0x4] sm:$0xf] %vm295_vm2, %v496_v22  ;;  %v379_v32 = vsel %vm320_vm3, %v363_v24, 0.0  ;;  %304 = vst.msk [vmem:[#allocation7 + $0x20] sm:$0xf] %vm295_vm2, %v503_v33  ;;  %v383_v41 = vsel %vm320_vm3, %v365_v26, 0.0  ;;  %v370_v1 = vmul.f32 %v751_v20, %v751_v20  ;;  %v371_v18 = vmul.f32 %v761_v29, %v761_v29 }
 0x106   :  { %v325_v34 = vadd.f32 %v324_v30, %v323_v27  ;;  %v380_v35 = vadd.f32 %v379_v32, %v378_v31  ;;  %307 = vst.msk [vmem:[#allocation7 + $0x2c] sm:$0xf] %vm295_vm2, %v506_v36  ;;  %305 = vst.msk [vmem:[#allocation7 + $0x24] sm:$0xf] %vm295_vm2, %v504_v39  ;;  %v336_v11 = vsel %vm320_vm3, %v751_v20, 0.0  ;;  %v372_v22 = vmul.f32 %v748_v16, %v748_v16 }
 0x107   :  { %v528_v38 = vpop.f32.mrb[4].mxu0  ;;  %v393_v17 = vsel %vm320_vm3, %v370_v1, 0.0  ;;  %v338_v23 = vsel %vm320_vm3, %v761_v29, 0.0 }
 0x108   :  { %v382_v42 = vadd.f32 %v381_v37, %v380_v35  ;;  %v501_v43 = vpack.c.bf16 %v528_v38, %v528_v38  ;;  %v184_v44 = vpop.f32.mrb[5].mxu0  ;;  %v327_v46 = vadd.f32 %v326_v40, %v325_v34  ;;  %v781_v50 = vpop.f32.mrb[4].mxu1  ;;  %v368_v59 = vmul.f32 %v528_v38, %v528_v38 }
 0x109   :  { %v499_v45 = vpack.c.bf16 %v184_v44, %v184_v44  ;;  %v328_v47 = vsel %vm320_vm3, %v184_v44, 0.0  ;;  %v366_v48 = vmul.f32 %v184_v44, %v184_v44  ;;  %v529_v49 = vpop.f32.mrb[6].mxu0  ;;  %v784_v54 = vpop.f32.mrb[5].mxu1  ;;  %v332_v2 = vsel %vm320_vm3, %v528_v38, 0.0 }
 0x10a   :  { %302 = vst.msk [vmem:[#allocation7 + $0x18] sm:$0xf] %vm295_vm2, %v501_v43  ;;  %v384_v51 = vadd.f32 %v383_v41, %v382_v42  ;;  %v502_v52 = vpack.c.bf16 %v529_v49, %v529_v49  ;;  %v187_v53 = vpop.f32.mrb[7].mxu0  ;;  %v329_v55 = vadd.f32 %v328_v47, %v327_v46  ;;  %v788_v58 = vpop.f32.mrb[6].mxu1  ;;  %v369_v3 = vmul.f32 %v529_v49, %v529_v49 }
 0x10b   :  { %300 = vst.msk [vmem:[#allocation7 + $0x10] sm:$0xf] %vm295_vm2, %v499_v45  ;;  %v385_v56 = vsel %vm320_vm3, %v366_v48, 0.0  ;;  %v500_v57 = vpack.c.bf16 %v187_v53, %v187_v53  ;;  %v330_v61 = vsel %vm320_vm3, %v187_v53, 0.0  ;;  %v367_v62 = vmul.f32 %v187_v53, %v187_v53  ;;  %v792_v63 = vpop.f32.mrb[7].mxu1 }
 0x10c   :  { %v386_v60 = vadd.f32 %v385_v56, %v384_v51  ;;  %303 = vst.msk [vmem:[#allocation7 + $0x1c] sm:$0xf] %vm295_vm2, %v502_v52  ;;  %v331_v0 = vadd.f32 %v330_v61, %v329_v55  ;;  %v509_v5 = vpack.c.bf16 %v781_v50, %v781_v50  ;;  %v507_v8 = vpack.c.bf16 %v784_v54, %v784_v54 }
 0x10d   :  { %301 = vst.msk [vmem:[#allocation7 + $0x14] sm:$0xf] %vm295_vm2, %v500_v57  ;;  %v387_v4 = vsel %vm320_vm3, %v367_v62, 0.0  ;;  %v389_v9 = vsel %vm320_vm3, %v368_v59, 0.0  ;;  %v334_v10 = vsel %vm320_vm3, %v529_v49, 0.0  ;;  %v510_v12 = vpack.c.bf16 %v788_v58, %v788_v58 }
 0x10e   :  { %v333_v6 = vadd.f32 %v332_v2, %v331_v0  ;;  %v388_v7 = vadd.f32 %v387_v4, %v386_v60  ;;  %310 = vst.msk [vmem:[#allocation7 + $0x38] sm:$0xf] %vm295_vm2, %v509_v5  ;;  %308 = vst.msk [vmem:[#allocation7 + $0x30] sm:$0xf] %vm295_vm2, %v507_v8  ;;  %v391_v15 = vsel %vm320_vm3, %v369_v3, 0.0  ;;  %v508_v19 = vpack.c.bf16 %v792_v63, %v792_v63 }
 0x10f   :  { %311 = vst.msk [vmem:[#allocation7 + $0x3c] sm:$0xf] %vm295_vm2, %v510_v12 }
 0x110   :  { %v390_v13 = vadd.f32 %v389_v9, %v388_v7  ;;  %v335_v14 = vadd.f32 %v334_v10, %v333_v6  ;;  %309 = vst.msk [vmem:[#allocation7 + $0x34] sm:$0xf] %vm295_vm2, %v508_v19 }
 0x112   :  { %v337_v20 = vadd.f32 %v336_v11, %v335_v14  ;;  %v392_v21 = vadd.f32 %v391_v15, %v390_v13 }
 0x114   :  { %v394_v24 = vadd.f32 %v393_v17, %v392_v21  ;;  %v339_v26 = vadd.f32 %v338_v23, %v337_v20 }
 0x115   :  { %612 = shalt.err (!%p609_p6)
}
 0x116   :  { %s613_s18 = scalar_lea.hbm %s903_s2, 1024 }
 0x117   :  { %p614_p7 = scmp.ne.s32.totalorder %s903_s2, %s613_s18  ;;  %p617_p8 = scmp.lt.u32.totalorder %s613_s18, %s903_s2 }
 0x119   :  { %p619_p9 = pnand %p617_p8, %p614_p7 }
 0x11b   :  { %622 = shalt.err (!%p619_p9)
}
 0x11c   :  { %428 = dma.vmem_to_hbm [thread:$0]  %s423_s14, 1024, %s903_s2, [#allocation4], %s676_s25, %s676_s25, %s677_s26   ;;  %v340_v27 = vsel %vm320_vm3, %v748_v16, 0.0  ;;  %v373_v28 = vmul.f32 %v756_v25, %v756_v25  ;;  %v395_v29 = vsel %vm320_vm3, %v371_v18, 0.0  ;;  %v374_v30 = vmul.f32 %v784_v54, %v784_v54  ;;  %v319_v2 = vld [vmem:[#allocation8] sm:$0x1] }
 0x11d   :  { %v341_v31 = vadd.f32 %v340_v27, %v339_v26  ;;  %v396_v32 = vadd.f32 %v395_v29, %v394_v24  ;;  %v397_v33 = vsel %vm320_vm3, %v372_v22, 0.0  ;;  %v342_v34 = vsel %vm320_vm3, %v756_v25, 0.0  ;;  %s681_s2 = smov [#allocation8]   ;;  %s682_s26 = smov [#allocation10]  }
 0x11e   :  { %v344_v35 = vsel %vm320_vm3, %v784_v54, 0.0  ;;  %v399_v37 = vsel %vm320_vm3, %v373_v28, 0.0  ;;  %v401_v38 = vsel %vm320_vm3, %v374_v30, 0.0  ;;  %v375_v39 = vmul.f32 %v792_v63, %v792_v63  ;;  %s435_s25 = sshll.u32 %s681_s2, 4  ;;  %s445_s27 = sshll.u32 %s682_s26, 4  ;;  %s436_s25 = int_to_ptr.vmem [resolvable:$true] %s435_s25  ;;  %s868_s27 = int_to_ptr.vmem [resolvable:$true] %s445_s27 }
 0x11f   :  { %v398_v36 = vadd.f32 %v397_v33, %v396_v32  ;;  %v343_v16 = vadd.f32 %v342_v34, %v341_v31  ;;  %v376_v42 = vmul.f32 %v781_v50, %v781_v50  ;;  %v346_v25 = vsel %vm320_vm3, %v792_v63, 0.0  ;;  %s623_s28 = scalar_lea.vmem %s436_s25, 16  ;;  %s627_s29 = scalar_lea.vmem %s436_s25, 32 }
 0x120   :  { %v348_v45 = vsel %vm320_vm3, %v781_v50, 0.0  ;;  %v377_v46 = vmul.f32 %v788_v58, %v788_v58  ;;  %v403_v47 = vsel %vm320_vm3, %v375_v39, 0.0  ;;  %v350_v52 = vsel %vm320_vm3, %v788_v58, 0.0  ;;  %v361_v58 = vld [vmem:[#allocation10] sm:$0x1]  ;;  %p624_p10 = scmp.ne.s32.totalorder %s436_s25, %s623_s28  ;;  %p628_p11 = scmp.lt.s32.totalorder %s436_s25, %s436_s25 }
 0x121   :  { %v345_v40 = vadd.f32 %v344_v35, %v343_v16  ;;  %v400_v41 = vadd.f32 %v399_v37, %v398_v36  ;;  %v405_v51 = vsel %vm320_vm3, %v376_v42, 0.0  ;;  %p629_p12 = scmp.lt.s32.totalorder %s627_s29, %s623_s28 }
 0x122   :  { %v407_v55 = vsel %vm320_vm3, %v377_v46, 0.0 }
 0x123   :  { %v402_v43 = vadd.f32 %v401_v38, %v400_v41  ;;  %v347_v44 = vadd.f32 %v346_v25, %v345_v40  ;;  %p630_p13 = por %p629_p12, %p628_p11 }
 0x125   :  { %v349_v48 = vadd.f32 %v348_v45, %v347_v44  ;;  %v404_v49 = vadd.f32 %v403_v47, %v402_v43  ;;  %p631_p0 = pnand %p630_p13, %p624_p10 }
 0x127   :  { %v351_v53 = vadd.f32 %v350_v52, %v349_v48  ;;  %v406_v54 = vadd.f32 %v405_v51, %v404_v49 }
 0x129   :  { %v352_v56 = vrot.slane %v351_v53, 4  ;;  %v408_v57 = vadd.f32 %v407_v55, %v406_v54 }
 0x12b   :  { %v353_v59 = vadd.f32 %v352_v56, %v351_v53  ;;  %v409_v50 = vrot.slane %v408_v57, 4 }
 0x12d   :  { %v354_v60 = vrot.slane %v353_v59, 2  ;;  %v410_v61 = vadd.f32 %v409_v50, %v408_v57 }
 0x12f   :  { %v355_v62 = vadd.f32 %v354_v60, %v353_v59  ;;  %v411_v63 = vrot.slane %v410_v61, 2 }
 0x131   :  { %v356_v0 = vrot.slane %v355_v62, 1  ;;  %v412_v1 = vadd.f32 %v411_v63, %v410_v61 }
 0x133   :  { %v357_v3 = vadd.f32 %v356_v0, %v355_v62  ;;  %v413_v4 = vrot.slane %v412_v1, 1 }
 0x135   :  { %v358_v5 = vadd.f32 %v357_v3, %v319_v2  ;;  %v414_v6 = vadd.f32 %v413_v4, %v412_v1 }
 0x137   :  { %360 = vst.msk [vmem:[#allocation8] sm:$0x1] %vm316_vm1, %v358_v5  ;;  %v415_v7 = vadd.f32 %v414_v6, %v361_v58 }
 0x138   :  { %634 = shalt.err (!%p631_p0)
}
 0x139   :  { %s635_s6 = scalar_lea.hbm %s904_s3, 16 }
 0x13a   :  { %p636_p1 = scmp.ne.s32.totalorder %s904_s3, %s635_s6  ;;  %p639_p2 = scmp.lt.u32.totalorder %s635_s6, %s904_s3 }
 0x13c   :  { %p641_p3 = pnand %p639_p2, %p636_p1 }
 0x13e   :  { %644 = shalt.err (!%p641_p3)
}
 0x13f   :  { %438 = dma.vmem_to_hbm [thread:$0]  %s436_s25, 16, %s904_s3, [#allocation9]   ;;  %416 = vst.msk [vmem:[#allocation10] sm:$0x1] %vm316_vm1, %v415_v7 }
 0x140   :  { %s645_s0 = scalar_lea.vmem %s868_s27, 16  ;;  %s649_s13 = scalar_lea.vmem %s868_s27, 32 }
 0x141   :  { %p646_p4 = scmp.ne.s32.totalorder %s868_s27, %s645_s0  ;;  %p650_p5 = scmp.lt.s32.totalorder %s868_s27, %s868_s27 }
 0x142   :  { %p651_p6 = scmp.lt.s32.totalorder %s649_s13, %s645_s0 }
 0x144   :  { %p652_p7 = por %p651_p6, %p650_p5 }
 0x146   :  { %p653_p8 = pnand %p652_p7, %p646_p4 }
 0x148   :  { %656 = shalt.err (!%p653_p8)
}
 0x149   :  { %s657_s15 = scalar_lea.hbm %s905_s4, 16 }
 0x14a   :  { %p658_p9 = scmp.ne.s32.totalorder %s905_s4, %s657_s15  ;;  %p661_p10 = scmp.lt.u32.totalorder %s657_s15, %s905_s4 }
 0x14c   :  { %p663_p11 = pnand %p661_p10, %p658_p9 }
 0x14e   :  { %666 = shalt.err (!%p663_p11)
}
 0x14f   :  { %448 = dma.vmem_to_hbm [thread:$0]  %s868_s27, 16, %s905_s4, [#allocation9]  }
 0x150   :  { %671 = dma.done.wait [#allocation4], 1024  }
 0x151   :  { %672 = vsyncadd [#allocation4], 4294966272 }
 0x152   :  { %673 = dma.done.wait [#allocation9], 32  }
 0x153   :  { %674 = vsyncadd [#allocation9], 4294967264 }
 0x154   :  { %458 = vsyncpa [#allocation3], 1 }
 0x155   :  { %459 = vsyncpa [#allocation6], 1 }
 0x156   :  { %460 = vsyncpa [#allocation4], 1 }
 0x157   :  { %461 = vsyncpa [#allocation9], 1 }

</bundles_post_ra>
